<compile_context>
chip_gen: v5e
topology: v5e:2x2
jax: 0.10.0
libtpu: 0.0.40
codegen_flags: <defaults>
</compile_context>

<pallas_src>
import jax
import jax.numpy as jnp
from jax.experimental import pallas as pl
from jax.experimental.pallas import tpu as pltpu

HID1, HID2 = 256, 128
BN_EPS = 1e-5


def _round_up(a, m):
    return (a + m - 1) // m * m


def _make_kernel(col_offsets):
    """col_offsets: static per-categorical-column row offsets into w1_cat."""

    def kernel(xcat_ref, xnum_ref, w1c_ref, w1n_ref, b1_ref,
               w2_ref, b2_ref, w3t_ref, b3_ref, o_ref):
        ids = xcat_ref[...]                                    # (tb, n_cat) int32
        tb = ids.shape[0]
        v_pad = w1c_ref.shape[0]

        # In-kernel embedding lookup fused into fc1: for tiny vocabs a one-hot
        # MXU matmul replaces gather + concat, so x never round-trips HBM.
        iota = jax.lax.broadcasted_iota(jnp.int32, (tb, v_pad), 1)
        onehot = jnp.zeros((tb, v_pad), jnp.float32)
        for c, off in enumerate(col_offsets):                  # static unroll (n_cat cols)
            onehot = onehot + (iota == (ids[:, c:c + 1] + off)).astype(jnp.float32)

        # fc1 (embedding-folded) + ReLU     (BN1 already folded into w2/b2)
        h = (jnp.dot(onehot, w1c_ref[...], preferred_element_type=jnp.float32)
             + jnp.dot(xnum_ref[...], w1n_ref[...], preferred_element_type=jnp.float32)
             + b1_ref[...])
        h = jnp.maximum(h, 0.0)                                # (tb, 256)
        # Dropout(0.3): identity at eval

        # fc2 (BN1-folded) + ReLU           (BN2 already folded into w3/b3)
        h = jnp.dot(h, w2_ref[...], preferred_element_type=jnp.float32) + b2_ref[...]
        h = jnp.maximum(h, 0.0)                                # (tb, 128)
        # Dropout(0.1): identity at eval

        # fc3 (BN2-folded), lane-dense: (1,128) . (tb,128)^T -> (1, tb)
        out_row = jax.lax.dot_general(
            w3t_ref[...], h,
            dimension_numbers=(((1,), (1,)), ((), ())),
            preferred_element_type=jnp.float32)
        o_ref[0] = out_row + b3_ref[0, 0]                      # folded fc3 bias in-kernel

    return kernel


def init_params(key, emb_dims, n_num):
    """Deterministic parameter init mirroring the PyTorch module's shapes."""
    n_emb = len(emb_dims)
    keys = jax.random.split(key, n_emb + 3)
    emb_tables = [
        jax.random.normal(keys[i], (n, d), jnp.float32)   # nn.Embedding default ~ N(0,1)
        for i, (n, d) in enumerate(emb_dims)
    ]
    d_in = sum(d for _, d in emb_dims) + n_num

    def linear(k, fan_in, fan_out):
        kw, kb = jax.random.split(k)
        bound = 1.0 / (fan_in ** 0.5)
        w = jax.random.uniform(kw, (fan_in, fan_out), jnp.float32, -bound, bound)
        b = jax.random.uniform(kb, (fan_out,), jnp.float32, -bound, bound)
        return w, b

    w1, b1 = linear(keys[n_emb + 0], d_in, HID1)
    w2, b2 = linear(keys[n_emb + 1], HID1, HID2)
    w3, b3 = linear(keys[n_emb + 2], HID2, 1)

    return dict(
        emb_tables=emb_tables,
        w1=w1, b1=b1, w2=w2, b2=b2, w3=w3, b3=b3,
        # BatchNorm1d defaults (eval uses running stats)
        bn1_gamma=jnp.ones((HID1,), jnp.float32), bn1_beta=jnp.zeros((HID1,), jnp.float32),
        bn1_mean=jnp.zeros((HID1,), jnp.float32), bn1_var=jnp.ones((HID1,), jnp.float32),
        bn2_gamma=jnp.ones((HID2,), jnp.float32), bn2_beta=jnp.zeros((HID2,), jnp.float32),
        bn2_mean=jnp.zeros((HID2,), jnp.float32), bn2_var=jnp.ones((HID2,), jnp.float32),
    )


def taxinet_forward(params, x_cat, x_num, *, tb=1024):
    """Eval-mode TaxiNet forward. tb = batch tile (multiple of 128)."""
    HI = jax.lax.Precision.HIGHEST   # tiny one-time folds: keep them exact

    emb_tables = params["emb_tables"]
    emb_dims = [(int(t.shape[0]), int(t.shape[1])) for t in emb_tables]
    n_cat = len(emb_dims)
    n_num = int(x_num.shape[1])
    B = int(x_cat.shape[0])

    # --- fold eval-mode BatchNorm into the downstream Linear layers ---
    s1 = params["bn1_gamma"] / jnp.sqrt(params["bn1_var"] + BN_EPS)
    t1 = params["bn1_beta"] - params["bn1_mean"] * s1
    s2 = params["bn2_gamma"] / jnp.sqrt(params["bn2_var"] + BN_EPS)
    t2 = params["bn2_beta"] - params["bn2_mean"] * s2

    w1 = params["w1"]                                          # (D, 256)
    E_sum = sum(d for _, d in emb_dims)
    V_total = sum(n for n, _ in emb_dims)
    V_pad = _round_up(V_total, 8)

    # --- fold embedding tables into fc1: w1_cat[off_c + idx] = table_c[idx] @ w1-block ---
    w1_cat = jnp.zeros((V_pad, HID1), jnp.float32)
    col_offsets = []
    v_off = d_off = 0
    for tbl, (n, d) in zip(emb_tables, emb_dims):
        col_offsets.append(v_off)
        w1_cat = w1_cat.at[v_off:v_off + n].set(
            jnp.dot(tbl, w1[d_off:d_off + d], precision=HI))
        v_off += n
        d_off += d
    w1_num = w1[E_sum:]                                        # (n_num, 256)

    b1 = params["b1"].reshape(1, HID1)
    w2 = params["w2"] * s1[:, None]                            # BN1 scale into w2 rows
    b2 = (jnp.dot(t1, params["w2"], precision=HI) + params["b2"]).reshape(1, HID2)
    w3t = (params["w3"] * s2[:, None]).T                       # (1, 128): BN2 scale into w3
    b3 = (jnp.dot(t2, params["w3"], precision=HI) + params["b3"]).reshape(1, 1)

    # --- tiling: large batch tile, cdiv grid, tail padding of raw inputs only ---
    B_ru = _round_up(B, 128)
    tb = max(128, min(_round_up(int(tb), 128), B_ru))
    tb = min(tb, 4096)   # keep double-buffered tiles well under v5e's 16 MiB scoped VMEM
    if B_ru // tb < 2 and B_ru >= 256:
        # >= 2 grid steps so both v7x TensorCores get work (also enables pipelining).
        tb = _round_up(max(128, B_ru // 2), 128)
    num_tiles = pl.cdiv(B, tb)
    B_pad = num_tiles * tb

    # Pad the tiny raw inputs (~36 B/row).  Pad index 0 is valid for every table;
    # rows are independent and the padded output rows are sliced off below.
    x_cat = x_cat.astype(jnp.int32)
    x_num = x_num.astype(jnp.float32)
    if B_pad != B:
        x_cat = jnp.pad(x_cat, ((0, B_pad - B), (0, 0)))
        x_num = jnp.pad(x_num, ((0, B_pad - B), (0, 0)))

    def full(a):
        return pl.BlockSpec(a.shape, lambda i: (0,) * a.ndim)

    flops = 2 * B_pad * (V_pad * HID1 + n_num * HID1 + HID1 * HID2 + HID2)
    bytes_accessed = (B_pad * 4 * (n_cat + n_num + 1)
                      + 4 * (V_pad * HID1 + n_num * HID1 + HID1
                             + HID1 * HID2 + HID2 + HID2 + 1))

    out = pl.pallas_call(
        _make_kernel(tuple(col_offsets)),
        out_shape=jax.ShapeDtypeStruct((num_tiles, 1, tb), jnp.float32),
        grid=(num_tiles,),
        in_specs=[
            pl.BlockSpec((tb, n_cat), lambda i: (i, 0)),       # categorical ids, batch-tiled
            pl.BlockSpec((tb, n_num), lambda i: (i, 0)),       # numeric features, batch-tiled
            full(w1_cat), full(w1_num), full(b1),
            full(w2), full(b2),
            full(w3t),
            pl.BlockSpec(memory_space=pltpu.MemorySpace.SMEM),  # folded fc3 bias (scalar)
        ],
        out_specs=pl.BlockSpec((1, 1, tb), lambda i: (i, 0, 0)),  # lane-dense output rows
        compiler_params=pltpu.CompilerParams(dimension_semantics=("parallel",)),
        cost_estimate=pl.CostEstimate(flops=flops, transcendentals=0,
                                      bytes_accessed=bytes_accessed),
    )(x_cat, x_num, w1_cat, w1_num, b1, w2, b2, w3t, b3)

    return out.reshape(-1)[:B]                                 # drop padding, squeeze(1)


def taxinet_reference(params, x_cat, x_num):
    """Pure-JAX reference of the same eval-mode forward, for a sanity check."""
    embs = [tbl[x_cat[:, i]] for i, tbl in enumerate(params["emb_tables"])]
    x = jnp.concatenate(embs + [x_num.astype(jnp.float32)], axis=1)
    h = jnp.maximum(x @ params["w1"] + params["b1"], 0.0)
    h = (h - params["bn1_mean"]) / jnp.sqrt(params["bn1_var"] + BN_EPS) * params["bn1_gamma"] + params["bn1_beta"]
    h = jnp.maximum(h @ params["w2"] + params["b2"], 0.0)
    h = (h - params["bn2_mean"]) / jnp.sqrt(params["bn2_var"] + BN_EPS) * params["bn2_gamma"] + params["bn2_beta"]
    return (h @ params["w3"] + params["b3"])[:, 0]


def _make_inputs(key, emb_dims, n_num, B):
    k_cat, k_num = jax.random.split(key)
    cat_keys = jax.random.split(k_cat, len(emb_dims))
    x_cat = jnp.stack(
        [jax.random.randint(cat_keys[i], (B,), 0, n, dtype=jnp.int32)
         for i, (n, _) in enumerate(emb_dims)], axis=1)        # (B, n_cat) int32
    x_num = jax.random.normal(k_num, (B, n_num), jnp.float32)  # (B, n_num) f32
    return x_cat, x_num


if __name__ == "__main__":
    key = jax.random.PRNGKey(0)
    k_param, k_data1, k_data2 = jax.random.split(key, 3)

    emb_dims = [(10, 4), (12, 8), (7, 6)]   # (vocab, emb_dim) per categorical feature
    n_num = 6
    params = init_params(k_param, emb_dims, n_num)

    # Small batch: single tile, tail padding 16 -> 128.
    B1 = 16
    x_cat1, x_num1 = _make_inputs(k_data1, emb_dims, n_num, B1)
    y1 = jax.block_until_ready(taxinet_forward(params, x_cat1, x_num1))
    y1_ref = jax.block_until_ready(taxinet_reference(params, x_cat1, x_num1))
    assert y1.shape == (B1,)
    assert jnp.allclose(y1, y1_ref, atol=2e-4, rtol=2e-4)

    # Ragged batch: exercises the >=2-grid-step split and tail padding.
    B2 = 333
    x_cat2, x_num2 = _make_inputs(k_data2, emb_dims, n_num, B2)
    y2 = jax.block_until_ready(taxinet_forward(params, x_cat2, x_num2))
    y2_ref = jax.block_until_ready(taxinet_reference(params, x_cat2, x_num2))
    assert y2.shape == (B2,)
    assert jnp.allclose(y2, y2_ref, atol=2e-4, rtol=2e-4)

    print("KERNEL_OK")
</pallas_src>

<mosaic_0001>
module attributes {stable_mosaic.version = 11 : i64} {
  func.func @kernel(%arg0: i32, %arg1: memref<128x3xi32, #tpu.memory_space<vmem>>, %arg2: memref<128x6xf32, #tpu.memory_space<vmem>>, %arg3: memref<32x256xf32, #tpu.memory_space<vmem>>, %arg4: memref<6x256xf32, #tpu.memory_space<vmem>>, %arg5: memref<1x256xf32, #tpu.memory_space<vmem>>, %arg6: memref<256x128xf32, #tpu.memory_space<vmem>>, %arg7: memref<1x128xf32, #tpu.memory_space<vmem>>, %arg8: memref<1x128xf32, #tpu.memory_space<vmem>>, %arg9: memref<1x1xf32, #tpu.memory_space<smem>>, %arg10: memref<1x1x128xf32, #tpu.memory_space<vmem>>) attributes {dimension_semantics = [#tpu.dimension_semantics<parallel>], iteration_bounds = array<i64: 1>, scalar_prefetch = 0 : i64, scratch_operands = 0 : i64, tpu.core_type = #tpu.core_type<tc>, window_params = [{transform_indices = @transform_0, window_bounds = array<i64: 128, 3>}, {transform_indices = @transform_1, window_bounds = array<i64: 128, 6>}, {pipeline_mode = #tpu.pipeline_mode<synchronous>, transform_indices = @transform_2, window_bounds = array<i64: 32, 256>}, {pipeline_mode = #tpu.pipeline_mode<synchronous>, transform_indices = @transform_3, window_bounds = array<i64: 6, 256>}, {pipeline_mode = #tpu.pipeline_mode<synchronous>, transform_indices = @transform_4, window_bounds = array<i64: 1, 256>}, {pipeline_mode = #tpu.pipeline_mode<synchronous>, transform_indices = @transform_5, window_bounds = array<i64: 256, 128>}, {pipeline_mode = #tpu.pipeline_mode<synchronous>, transform_indices = @transform_6, window_bounds = array<i64: 1, 128>}, {pipeline_mode = #tpu.pipeline_mode<synchronous>, transform_indices = @transform_7, window_bounds = array<i64: 1, 128>}, {transform_indices = @transform_8, window_bounds = array<i64: 1, 1>}, {transform_indices = @transform_9, window_bounds = array<i64: 1, 1, 128>}]} {
    %c0 = arith.constant 0 : index
    %c0_0 = arith.constant 0 : index
    %0 = vector.load %arg1[%c0, %c0_0] : memref<128x3xi32, #tpu.memory_space<vmem>>, vector<128x3xi32>
    %1 = tpu.iota {dimensions = array<i32: 1>} : vector<128x32xi32>
    %cst = arith.constant 0.000000e+00 : f32
    %2 = vector.broadcast %cst : f32 to vector<128x32xf32>
    %3 = vector.extract_strided_slice %0 {offsets = [0, 0], sizes = [128, 1], strides = [1, 1]} : vector<128x3xi32> to vector<128x1xi32>
    %c0_i32 = arith.constant 0 : i32
    %4 = vector.broadcast %c0_i32 : i32 to vector<128x1xi32>
    %5 = arith.addi %3, %4 : vector<128x1xi32>
    %6 = vector.broadcast %5 : vector<128x1xi32> to vector<128x32xi32>
    %7 = arith.cmpi eq, %1, %6 : vector<128x32xi32>
    %8 = arith.extui %7 : vector<128x32xi1> to vector<128x32xi32>
    %9 = arith.sitofp %8 : vector<128x32xi32> to vector<128x32xf32>
    %10 = arith.addf %2, %9 : vector<128x32xf32>
    %11 = vector.extract_strided_slice %0 {offsets = [0, 1], sizes = [128, 1], strides = [1, 1]} : vector<128x3xi32> to vector<128x1xi32>
    %c10_i32 = arith.constant 10 : i32
    %12 = vector.broadcast %c10_i32 : i32 to vector<128x1xi32>
    %13 = arith.addi %11, %12 : vector<128x1xi32>
    %14 = vector.broadcast %13 : vector<128x1xi32> to vector<128x32xi32>
    %15 = arith.cmpi eq, %1, %14 : vector<128x32xi32>
    %16 = arith.extui %15 : vector<128x32xi1> to vector<128x32xi32>
    %17 = arith.sitofp %16 : vector<128x32xi32> to vector<128x32xf32>
    %18 = arith.addf %10, %17 : vector<128x32xf32>
    %19 = vector.extract_strided_slice %0 {offsets = [0, 2], sizes = [128, 1], strides = [1, 1]} : vector<128x3xi32> to vector<128x1xi32>
    %c22_i32 = arith.constant 22 : i32
    %20 = vector.broadcast %c22_i32 : i32 to vector<128x1xi32>
    %21 = arith.addi %19, %20 : vector<128x1xi32>
    %22 = vector.broadcast %21 : vector<128x1xi32> to vector<128x32xi32>
    %23 = arith.cmpi eq, %1, %22 : vector<128x32xi32>
    %24 = arith.extui %23 : vector<128x32xi1> to vector<128x32xi32>
    %25 = arith.sitofp %24 : vector<128x32xi32> to vector<128x32xf32>
    %26 = arith.addf %18, %25 : vector<128x32xf32>
    %c0_1 = arith.constant 0 : index
    %c0_2 = arith.constant 0 : index
    %27 = vector.load %arg3[%c0_1, %c0_2] : memref<32x256xf32, #tpu.memory_space<vmem>>, vector<32x256xf32>
    %cst_3 = arith.constant dense<0.000000e+00> : vector<128x256xf32>
    %28 = tpu.matmul %26, %27, %cst_3 {dimension_numbers = #tpu.dot_dimension_numbers<[1], [0], [0], [1], [0, 0, 1, 1], [], []>} : vector<128x32xf32>, vector<32x256xf32>, vector<128x256xf32> -> vector<128x256xf32>
    %c0_4 = arith.constant 0 : index
    %c0_5 = arith.constant 0 : index
    %29 = vector.load %arg2[%c0_4, %c0_5] : memref<128x6xf32, #tpu.memory_space<vmem>>, vector<128x6xf32>
    %c0_6 = arith.constant 0 : index
    %c0_7 = arith.constant 0 : index
    %30 = vector.load %arg4[%c0_6, %c0_7] : memref<6x256xf32, #tpu.memory_space<vmem>>, vector<6x256xf32>
    %cst_8 = arith.constant dense<0.000000e+00> : vector<128x256xf32>
    %31 = tpu.matmul %29, %30, %cst_8 {dimension_numbers = #tpu.dot_dimension_numbers<[1], [0], [0], [1], [0, 0, 1, 1], [], []>} : vector<128x6xf32>, vector<6x256xf32>, vector<128x256xf32> -> vector<128x256xf32>
    %32 = arith.addf %28, %31 : vector<128x256xf32>
    %c0_9 = arith.constant 0 : index
    %c0_10 = arith.constant 0 : index
    %33 = vector.load %arg5[%c0_9, %c0_10] : memref<1x256xf32, #tpu.memory_space<vmem>>, vector<1x256xf32>
    %34 = vector.broadcast %33 : vector<1x256xf32> to vector<128x256xf32>
    %35 = arith.addf %32, %34 : vector<128x256xf32>
    %cst_11 = arith.constant 0.000000e+00 : f32
    %36 = vector.broadcast %cst_11 : f32 to vector<128x256xf32>
    %37 = arith.maximumf %35, %36 : vector<128x256xf32>
    %c0_12 = arith.constant 0 : index
    %c0_13 = arith.constant 0 : index
    %38 = vector.load %arg6[%c0_12, %c0_13] : memref<256x128xf32, #tpu.memory_space<vmem>>, vector<256x128xf32>
    %cst_14 = arith.constant dense<0.000000e+00> : vector<128x128xf32>
    %39 = tpu.matmul %37, %38, %cst_14 {dimension_numbers = #tpu.dot_dimension_numbers<[1], [0], [0], [1], [0, 0, 1, 1], [], []>} : vector<128x256xf32>, vector<256x128xf32>, vector<128x128xf32> -> vector<128x128xf32>
    %c0_15 = arith.constant 0 : index
    %c0_16 = arith.constant 0 : index
    %40 = vector.load %arg7[%c0_15, %c0_16] : memref<1x128xf32, #tpu.memory_space<vmem>>, vector<1x128xf32>
    %41 = vector.broadcast %40 : vector<1x128xf32> to vector<128x128xf32>
    %42 = arith.addf %39, %41 : vector<128x128xf32>
    %cst_17 = arith.constant 0.000000e+00 : f32
    %43 = vector.broadcast %cst_17 : f32 to vector<128x128xf32>
    %44 = arith.maximumf %42, %43 : vector<128x128xf32>
    %c0_18 = arith.constant 0 : index
    %c0_19 = arith.constant 0 : index
    %45 = vector.load %arg8[%c0_18, %c0_19] : memref<1x128xf32, #tpu.memory_space<vmem>>, vector<1x128xf32>
    %cst_20 = arith.constant dense<0.000000e+00> : vector<1x128xf32>
    %46 = tpu.matmul %45, %44, %cst_20 {dimension_numbers = #tpu.dot_dimension_numbers<[1], [1], [0], [0], [0, 0, 1, 0], [], []>} : vector<1x128xf32>, vector<128x128xf32>, vector<1x128xf32> -> vector<1x128xf32>
    %c0_21 = arith.constant 0 : index
    %c0_22 = arith.constant 0 : index
    %47 = memref.load %arg9[%c0_21, %c0_22] : memref<1x1xf32, #tpu.memory_space<smem>>
    %48 = vector.broadcast %47 : f32 to vector<1x128xf32>
    %49 = arith.addf %46, %48 : vector<1x128xf32>
    %c0_23 = arith.constant 0 : index
    %c0_24 = arith.constant 0 : index
    %c0_25 = arith.constant 0 : index
    %50 = vector.load %arg10[%c0_23, %c0_24, %c0_25] : memref<1x1x128xf32, #tpu.memory_space<vmem>>, vector<1x1x128xf32>
    %51 = vector.shape_cast %50 : vector<1x1x128xf32> to vector<1x128xf32>
    %52 = vector.shape_cast %49 : vector<1x128xf32> to vector<1x1x128xf32>
    tpu.vector_store %arg10[%c0_23, %c0_24, %c0_25], %52 {strides = array<i32>} : memref<1x1x128xf32, #tpu.memory_space<vmem>>, vector<1x1x128xf32>,
    return
  }
  func.func @transform_0(%arg0: i32) -> (i32, i32) {
    %c0_i32 = arith.constant 0 : i32
    %c0_i32_0 = arith.constant 0 : i32
    return %arg0, %c0_i32 : i32, i32
  }
  func.func @transform_1(%arg0: i32) -> (i32, i32) {
    %c0_i32 = arith.constant 0 : i32
    %c0_i32_0 = arith.constant 0 : i32
    return %arg0, %c0_i32 : i32, i32
  }
  func.func @transform_2(%arg0: i32) -> (i32, i32) {
    %c0_i32 = arith.constant 0 : i32
    %c0_i32_0 = arith.constant 0 : i32
    %c0_i32_1 = arith.constant 0 : i32
    return %c0_i32, %c0_i32_0 : i32, i32
  }
  func.func @transform_3(%arg0: i32) -> (i32, i32) {
    %c0_i32 = arith.constant 0 : i32
    %c0_i32_0 = arith.constant 0 : i32
    %c0_i32_1 = arith.constant 0 : i32
    return %c0_i32, %c0_i32_0 : i32, i32
  }
  func.func @transform_4(%arg0: i32) -> (i32, i32) {
    %c0_i32 = arith.constant 0 : i32
    %c0_i32_0 = arith.constant 0 : i32
    %c0_i32_1 = arith.constant 0 : i32
    return %c0_i32, %c0_i32_0 : i32, i32
  }
  func.func @transform_5(%arg0: i32) -> (i32, i32) {
    %c0_i32 = arith.constant 0 : i32
    %c0_i32_0 = arith.constant 0 : i32
    %c0_i32_1 = arith.constant 0 : i32
    return %c0_i32, %c0_i32_0 : i32, i32
  }
  func.func @transform_6(%arg0: i32) -> (i32, i32) {
    %c0_i32 = arith.constant 0 : i32
    %c0_i32_0 = arith.constant 0 : i32
    %c0_i32_1 = arith.constant 0 : i32
    return %c0_i32, %c0_i32_0 : i32, i32
  }
  func.func @transform_7(%arg0: i32) -> (i32, i32) {
    %c0_i32 = arith.constant 0 : i32
    %c0_i32_0 = arith.constant 0 : i32
    %c0_i32_1 = arith.constant 0 : i32
    return %c0_i32, %c0_i32_0 : i32, i32
  }
  func.func @transform_8(%arg0: i32) -> (i32, i32) {
    %c0_i32 = arith.constant 0 : i32
    %c0_i32_0 = arith.constant 0 : i32
    %c0_i32_1 = arith.constant 0 : i32
    return %c0_i32, %c0_i32_0 : i32, i32
  }
  func.func @transform_9(%arg0: i32) -> (i32, i32, i32) {
    %c0_i32 = arith.constant 0 : i32
    %c0_i32_0 = arith.constant 0 : i32
    %c0_i32_1 = arith.constant 0 : i32
    return %arg0, %c0_i32, %c0_i32_0 : i32, i32, i32
  }
}

</mosaic_0001>

<bundles_post_ra>
// kernel: tpu_custom_call.1
= control target key start
LH: loop header
LB: loop body
LE: loop exit
PB: predicated region body
PF: predicated region fallthrough
CT: control target
= control target key end

     0   :  { %15 = vsyncpa [#allocation4], 0  ;;  %s1973_s0 = inlined_call_operand.vmem [shape: s32[128,3], index: 0, kind: input, shape index: {}]   ;;  %s1974_s1 = inlined_call_operand.vmem [shape: f32[128,6], index: 1, kind: input, shape index: {}]   ;;  %s1975_s2 = inlined_call_operand.hbm [shape: f32[32,256], index: 2, kind: input, shape index: {}]   ;;  %s1976_s3 = inlined_call_operand.vmem [shape: f32[6,256], index: 3, kind: input, shape index: {}]   ;;  %s1977_s4 = inlined_call_operand.vmem [shape: f32[1,256], index: 4, kind: input, shape index: {}]   ;;  %s1978_s5 = inlined_call_operand.vmem [shape: f32[256,128], index: 5, kind: input, shape index: {}]   ;;  %s1979_s6 = inlined_call_operand.hbm [shape: f32[1,128], index: 6, kind: input, shape index: {}]   ;;  %s1980_s7 = inlined_call_operand.vmem [shape: f32[1,128], index: 7, kind: input, shape index: {}]   ;;  %s1981_s8 = inlined_call_operand.<no memory space> [shape: f32[1,1], index: 8, kind: input, shape index: {}]   ;;  %s1982_s9 = inlined_call_operand.hbm [shape: f32[1,1,128], index: 9, kind: output, shape index: {}]  }
   0x1   :  { %16 = vsyncpa [#allocation7], 0 }
   0x2   :  { %17 = vsyncpa [#allocation5], 0  ;;  %s26_s11 = sshll.u32 %s1975_s2, 4  ;;  %s1372_s12 = smov [#allocation3]   ;;  %s27_s11 = int_to_ptr.hbm [resolvable:$true] %s26_s11 }
   0x3   :  { %s28_s13 = sshll.u32 %s1372_s12, 4  ;;  %s46_s16 = sshll.u32 %s1979_s6, 4  ;;  %s29_s13 = int_to_ptr.vmem [resolvable:$true] %s28_s13  ;;  %s47_s16 = int_to_ptr.hbm [resolvable:$true] %s46_s16 }
   0x4   :  { %s1373_s17 = smov 256   ;;  %s1374_s18 = smov 16  }
   0x5   :  { %34 = dma.hbm_to_vmem [thread:$0]  %s27_s11, 1024, %s29_s13, [#allocation4], %s1373_s17, %s1373_s17, %s1374_s18  }
   0x6   :  { %s1375_s19 = smov [#allocation6]  }
   0x7   :  { %s48_s20 = sshll.u32 %s1375_s19, 4  ;;  %s49_s20 = int_to_ptr.vmem [resolvable:$true] %s48_s20 }
   0x8   :  { %51 = dma.hbm_to_vmem [thread:$0]  %s47_s16, 16, %s49_s20, [#allocation7]  }
   0x9   :  { %1366 = dma.done.wait [#allocation4], 1024  }
   0xa   :  { %1367 = vsyncadd [#allocation4], 4294966272 }
   0xb   :  { %1368 = dma.done.wait [#allocation7], 16  }
   0xc   :  { %1369 = vsyncadd [#allocation7], 4294967280  ;;  %v1376_v0 = vmov 0   ;;  %v1377_v1 = vmov 1   ;;  %v65_v2 = vld [vmem:[%s1973_s0 + $0x8] sm:$0xff]  ;;  %v64_v3 = vld [vmem:[%s1973_s0] sm:$0xff] }
   0xd   :  { %1262 = vset.pattern.permute.xlu1 %v1376_v0  ;;  %1260 = vset.pattern.permute.xlu0 %v1376_v0  ;;  %v195_v4 = vadd.s32 10, %v65_v2  ;;  %v322_v5 = vadd.s32 22, %v64_v3  ;;  %v194_v6 = vadd.s32 10, %v64_v3  ;;  %v323_v7 = vadd.s32 22, %v65_v2  ;;  %v66_v9 = vld [vmem:[%s1973_s0 + $0x10] sm:$0xff]  ;;  %v68_v12 = vld [vmem:[%s1973_s0 + $0x20] sm:$0xff] }
   0xe   :  { %1265 = vset.pattern.permute.xlu2 %v1377_v1  ;;  %86 = vperm.xlu1 %1262, %v65_v2   ;;  %v1378_v8 = vmov 2   ;;  %v324_v10 = vadd.s32 22, %v66_v9  ;;  %v196_v11 = vadd.s32 10, %v66_v9  ;;  %v67_v13 = vld [vmem:[%s1973_s0 + $0x18] sm:$0xff]  ;;  %v198_v14 = vadd.s32 10, %v68_v12  ;;  %v70_v17 = vld [vmem:[%s1973_s0 + $0x30] sm:$0xff] }
   0xf   :  { %83 = vperm.xlu0 %1260, %v64_v3   ;;  %214 = vperm.xlu2 %1265, %v195_v4   ;;  %v197_v15 = vadd.s32 10, %v67_v13  ;;  %v325_v16 = vadd.s32 22, %v67_v13  ;;  %v474_v18 = vld [vmem:[%s1976_s3] sm:$0x3f]  ;;  %vm525_vm0 = vcmask 1045504   ;;  %v71_v20 = vld [vmem:[%s1973_s0 + $0x38] sm:$0xff]  ;;  %v80_v3 = vlaneseq }
  0x10   :  { %v475_v19 = vld [vmem:[%s1976_s3 + $0x8] sm:$0x3f]  ;;  %1249 = vmatpush.msk.msra.mxu3 %vm525_vm0, %v474_v18  ;;  %vm476_vm1 = vcmask 48128   ;;  %v326_v22 = vadd.s32 22, %v68_v12  ;;  %1183 = vmatpush.msk.msra.mxu0 %vm525_vm0, %v474_v18  ;;  %v329_v23 = vadd.s32 22, %v71_v20  ;;  %v468_v25 = vld [vmem:[%s1974_s1 + $0x50] sm:$0xff] }
  0x11   :  { %1250 = vmatpush.msk.msra.mxu2 %vm525_vm0, %v475_v19  ;;  %v467_v21 = vld [vmem:[%s1974_s1 + $0x48] sm:$0xff]  ;;  %1200 = vmatpush.msk.msra.mxu1 %vm525_vm0, %v475_v19  ;;  %v469_v30 = vld [vmem:[%s1974_s1 + $0x58] sm:$0xff]  ;;  %v200_v31 = vadd.s32 10, %v70_v17  ;;  %v328_v32 = vadd.s32 22, %v70_v17  ;;  %v470_v33 = vld [vmem:[%s1974_s1 + $0x60] sm:$0xff]  ;;  %v201_v34 = vadd.s32 10, %v71_v20 }
  0x12   :  { %1193 = vmatmul.msk.f32.vlgmr.msra.gmra.mxu3 %vm476_vm1, %v467_v21  ;;  %1210 = vmatmul.msk.f32.vlgmr.msra.gmra.mxu2 %vm476_vm1, %v467_v21  ;;  %v69_v24 = vld [vmem:[%s1973_s0 + $0x28] sm:$0xff]  ;;  %v75_v36 = vld [vmem:[%s1973_s0 + $0x58] sm:$0xff]  ;;  %v72_v37 = vld [vmem:[%s1973_s0 + $0x40] sm:$0xff]  ;;  %vm662_vm7 = vcmask 261120   ;;  %s1380_s29 = smov [#allocation8]  }
  0x13   :  { %v199_v26 = vadd.s32 10, %v69_v24  ;;  %v327_v27 = vadd.s32 22, %v69_v24  ;;  %v73_v28 = vld [vmem:[%s1973_s0 + $0x48] sm:$0xff]  ;;  %v202_v38 = vadd.s32 10, %v72_v37  ;;  %v472_v39 = vld [vmem:[%s1974_s1 + $0x70] sm:$0xff]  ;;  %v330_v40 = vadd.s32 22, %v72_v37 }
  0x14   :  { %v203_v29 = vadd.s32 10, %v73_v28  ;;  %v471_v35 = vld [vmem:[%s1974_s1 + $0x68] sm:$0xff]  ;;  %v76_v41 = vld [vmem:[%s1973_s0 + $0x60] sm:$0xff]  ;;  %v473_v42 = vld [vmem:[%s1974_s1 + $0x78] sm:$0xff]  ;;  %v331_v46 = vadd.s32 22, %v73_v28  ;;  %v205_v61 = vadd.s32 10, %v75_v36 }
  0x15   :  { %v334_v43 = vadd.s32 22, %v76_v41  ;;  %v456_v44 = vld [vmem:[#allocation3 + $0x30] sm:$0xff]  ;;  %v457_v45 = vld [vmem:[#allocation3 + $0x38] sm:$0xff]  ;;  %v454_v48 = vld [vmem:[#allocation3 + $0x20] sm:$0xff]  ;;  %v333_v62 = vadd.s32 22, %v75_v36  ;;  %s1122_s30 = sshll.u32 %s1380_s29, 4  ;;  %s1123_s30 = int_to_ptr.vmem [resolvable:$true] %s1122_s30 }
  0x16   :  { %1263 = vset.pattern.permute.xlu1 %v1378_v8  ;;  %723 = vmatpush.msrb.mxu2 %v456_v44  ;;  %v455_v49 = vld [vmem:[#allocation3 + $0x28] sm:$0xff]  ;;  %v452_v50 = vld [vmem:[#allocation3 + $0x10] sm:$0xff]  ;;  %v453_v51 = vld [vmem:[#allocation3 + $0x18] sm:$0xff] }
  0x17   :  { %1261 = vset.pattern.permute.xlu0 %v1377_v1  ;;  %339 = vperm.xlu1 %1263, %v322_v5   ;;  %v74_v52 = vld [vmem:[%s1973_s0 + $0x50] sm:$0xff]  ;;  %v450_v53 = vld [vmem:[#allocation3] sm:$0xff]  ;;  %v451_v54 = vld [vmem:[#allocation3 + $0x8] sm:$0xff] }
  0x18   :  { %211 = vperm.xlu0 %1261, %v194_v6   ;;  %1266 = vset.pattern.permute.xlu2 %v1378_v8  ;;  %v204_v55 = vadd.s32 10, %v74_v52  ;;  %v332_v56 = vadd.s32 22, %v74_v52  ;;  %v458_v58 = vld [vmem:[%s1974_s1] sm:$0xff]  ;;  %v1552_v59 = vld [vmem:[%s1973_s0 + $0x70] sm:$0xff]  ;;  %v459_v2 = vld [vmem:[%s1974_s1 + $0x8] sm:$0xff]  ;;  %v1562_v6 = vand.u32 127, %v80_v3 }
  0x19   :  { %342 = vperm.xlu2 %1266, %v323_v7   ;;  %788 = vmatpush.msrb.mxu3 %v457_v45  ;;  %v208_v60 = vadd.s32 10, %v1552_v59 }
  0x1a   :  { %1194 = vmatmul.msk.f32.gmra.mxu3 %vm476_vm1, %v468_v25  ;;  %1211 = vmatmul.msk.f32.gmra.mxu2 %vm476_vm1, %v468_v25 }
  0x1b   :  { %724 = vmatpush.msrb.mxu2 %v454_v48  ;;  %789 = vmatpush.msrb.mxu3 %v455_v49 }
  0x1c   :  { %1184 = vmatmul.msk.f32.vlgmr.msra.gmra.mxu0 %vm476_vm1, %v458_v58  ;;  %1201 = vmatmul.msk.f32.vlgmr.msra.gmra.mxu1 %vm476_vm1, %v458_v58  ;;  %v465_v58 = vld [vmem:[%s1974_s1 + $0x38] sm:$0xff] }
  0x1d   :  { %725 = vmatpush.msrb.mxu2 %v452_v50  ;;  %790 = vmatpush.msrb.mxu3 %v453_v51 }
  0x1f   :  { %1264 = vset.pattern.permute.xlu1 %v1376_v0  ;;  %726 = vmatpush.msrb.mxu2 %v450_v53  ;;  %v464_v53 = vld [vmem:[%s1974_s1 + $0x30] sm:$0xff] }
  0x20   :  { %1268 = vset.pattern.permute.xlu0 %v1378_v8  ;;  %89 = vperm.xlu1 %1264, %v66_v9   ;;  %v206_v9 = vadd.s32 10, %v76_v41 }
  0x21   :  { %345 = vperm.xlu0 %1268, %v324_v10   ;;  %1267 = vset.pattern.permute.xlu2 %v1377_v1  ;;  %v460_v10 = vld [vmem:[%s1974_s1 + $0x10] sm:$0xff] }
  0x22   :  { %217 = vperm.xlu2 %1267, %v196_v11   ;;  %1195 = vmatmul.msk.f32.gmra.mxu3 %vm476_vm1, %v469_v30  ;;  %v1379_v11 = vmov 0.0  }
  0x23   :  { %1212 = vmatmul.msk.f32.gmra.mxu2 %vm476_vm1, %v469_v30  ;;  %791 = vmatpush.msrb.mxu3 %v451_v54 }
  0x24   :  { %1185 = vmatmul.msk.f32.gmra.mxu0 %vm476_vm1, %v459_v2  ;;  %1202 = vmatmul.msk.f32.gmra.mxu1 %vm476_vm1, %v459_v2 }
  0x28   :  { %92 = vperm.xlu1 %1264, %v67_v13  }
  0x29   :  { %1271 = vset.pattern.permute.xlu0 %v1377_v1 }
  0x2a   :  { %223 = vperm.xlu0 %1271, %v198_v14   ;;  %220 = vperm.xlu2 %1267, %v197_v15  }
  0x2b   :  { %1196 = vmatmul.msk.f32.gmra.mxu3 %vm476_vm1, %v470_v33  ;;  %1213 = vmatmul.msk.f32.gmra.mxu2 %vm476_vm1, %v470_v33 }
  0x2c   :  { %1186 = vmatmul.msk.f32.gmra.mxu0 %vm476_vm1, %v460_v10  ;;  %1203 = vmatmul.msk.f32.gmra.mxu1 %vm476_vm1, %v460_v10 }
  0x30   :  { %1269 = vset.pattern.permute.xlu1 %v1378_v8 }
  0x31   :  { %348 = vperm.xlu1 %1269, %v325_v16   ;;  %v77_v16 = vld [vmem:[%s1973_s0 + $0x68] sm:$0xff] }
  0x32   :  { %1274 = vset.pattern.permute.xlu0 %v1376_v0  ;;  %1270 = vset.pattern.permute.xlu2 %v1376_v0 }
  0x33   :  { %101 = vperm.xlu0 %1274, %v70_v17   ;;  %95 = vperm.xlu2 %1270, %v68_v12  }
  0x34   :  { %1197 = vmatmul.msk.f32.gmra.mxu3 %vm476_vm1, %v471_v35  ;;  %1214 = vmatmul.msk.f32.gmra.mxu2 %vm476_vm1, %v471_v35 }
  0x39   :  { %351 = vperm.xlu1 %1269, %v326_v22   ;;  %v461_v22 = vld [vmem:[%s1974_s1 + $0x18] sm:$0xff] }
  0x3a   :  { %1187 = vmatmul.msk.f32.gmra.mxu0 %vm476_vm1, %v461_v22  ;;  %1204 = vmatmul.msk.f32.gmra.mxu1 %vm476_vm1, %v461_v22 }
  0x3b   :  { %1277 = vset.pattern.permute.xlu0 %v1378_v8  ;;  %98 = vperm.xlu2 %1270, %v69_v24  }
  0x3c   :  { %360 = vperm.xlu0 %1277, %v329_v23   ;;  %1198 = vmatmul.msk.f32.gmra.mxu3 %vm476_vm1, %v472_v39 }
  0x3d   :  { %1215 = vmatmul.msk.f32.gmra.mxu2 %vm476_vm1, %v472_v39 }
  0x41   :  { %1272 = vset.pattern.permute.xlu1 %v1377_v1 }
  0x42   :  { %226 = vperm.xlu1 %1272, %v199_v26  }
  0x43   :  { %1273 = vset.pattern.permute.xlu2 %v1378_v8 }
  0x44   :  { %1280 = vset.pattern.permute.xlu0 %v1377_v1  ;;  %354 = vperm.xlu2 %1273, %v327_v27  }
  0x45   :  { %238 = vperm.xlu0 %1280, %v203_v29   ;;  %1199 = vmatmul.msk.f32.gmra.mxu3 %vm476_vm1, %v473_v42 }
  0x46   :  { %1216 = vmatmul.msk.f32.gmra.mxu2 %vm476_vm1, %v473_v42  ;;  %v79_v42 = vld [vmem:[%s1973_s0 + $0x78] sm:$0xff]  ;;  %s1124_s0 = sshll.u32 %s1982_s9, 4  ;;  %s1125_s0 = int_to_ptr.hbm [resolvable:$true] %s1124_s0 }
  0x47   :  { %v337_v50 = vadd.s32 22, %v79_v42 }
  0x4a   :  { %229 = vperm.xlu1 %1272, %v200_v31  }
  0x4c   :  { %357 = vperm.xlu2 %1273, %v328_v32   ;;  %v462_v32 = vld [vmem:[%s1974_s1 + $0x20] sm:$0xff] }
  0x4d   :  { %1283 = vset.pattern.permute.xlu0 %v1376_v0  ;;  %1188 = vmatmul.msk.f32.gmra.mxu0 %vm476_vm1, %v462_v32 }
  0x4e   :  { %116 = vperm.xlu0 %1283, %v75_v36   ;;  %1205 = vmatmul.msk.f32.gmra.mxu1 %vm476_vm1, %v462_v32 }
  0x52   :  { %1275 = vset.pattern.permute.xlu1 %v1376_v0 }
  0x53   :  { %104 = vperm.xlu1 %1275, %v71_v20   ;;  %v207_v20 = vadd.s32 10, %v77_v16 }
  0x54   :  { %1276 = vset.pattern.permute.xlu2 %v1377_v1 }
  0x55   :  { %232 = vperm.xlu2 %1276, %v201_v34  }
  0x56   :  { %1286 = vset.pattern.permute.xlu0 %v1378_v8 }
  0x57   :  { %375 = vperm.xlu0 %1286, %v334_v43  }
  0x5b   :  { %107 = vperm.xlu1 %1275, %v72_v37  }
  0x5d   :  { %235 = vperm.xlu2 %1276, %v202_v38   ;;  %v336_v38 = vadd.s32 22, %v1552_v59 }
  0x5f   :  { %1289 = vset.pattern.permute.xlu0 %v1377_v1 }
  0x60   :  { %253 = vperm.xlu0 %1289, %v208_v60  }
  0x63   :  { %1278 = vset.pattern.permute.xlu1 %v1378_v8 }
  0x64   :  { %363 = vperm.xlu1 %1278, %v330_v40   ;;  %v463_v40 = vld [vmem:[%s1974_s1 + $0x28] sm:$0xff] }
  0x65   :  { %1279 = vset.pattern.permute.xlu2 %v1376_v0  ;;  %1189 = vmatmul.msk.f32.gmra.mxu0 %vm476_vm1, %v463_v40 }
  0x66   :  { %110 = vperm.xlu2 %1279, %v73_v28   ;;  %v335_v28 = vadd.s32 22, %v77_v16  ;;  %1206 = vmatmul.msk.f32.gmra.mxu1 %vm476_vm1, %v463_v40 }
  0x68   :  { %1292 = vset.pattern.permute.xlu0 %v1378_v8 }
  0x69   :  { %v1537_v47 = vpop.permute.xlu2 %214 }
  0x6a   :  { %vm259_vm5 = vcmp.eq.s32.totalorder %v1562_v6, %v1537_v47  ;;  %v209_v47 = vadd.s32 10, %v79_v42 }
  0x6b   :  { %v1152_v23 = vsel %vm259_vm5, 1.0, %v1379_v11 }
  0x6c   :  { %366 = vperm.xlu1 %1278, %v331_v46  }
  0x6d   :  { %1190 = vmatmul.msk.f32.gmra.mxu0 %vm476_vm1, %v464_v53 }
  0x6e   :  { %113 = vperm.xlu2 %1279, %v74_v52   ;;  %1207 = vmatmul.msk.f32.gmra.mxu1 %vm476_vm1, %v464_v53  ;;  %v938_v53 = vld [vmem:[%s1978_s5 + $0xd8] sm:$0xff] }
  0x73   :  { %v343_v57 = vpop.permute.xlu2 %342 }
  0x74   :  { %1281 = vset.pattern.permute.xlu1 %v1377_v1  ;;  %vm387_vm8 = vcmp.eq.s32.totalorder %v1562_v6, %v343_v57 }
  0x75   :  { %241 = vperm.xlu1 %1281, %v204_v55   ;;  %v1168_v27 = vsel %vm387_vm8, 1.0, %v1379_v11  ;;  %1191 = vmatmul.msk.f32.gmra.mxu0 %vm476_vm1, %v465_v58 }
  0x76   :  { %1282 = vset.pattern.permute.xlu2 %v1378_v8  ;;  %1208 = vmatmul.msk.f32.gmra.mxu1 %vm476_vm1, %v465_v58 }
  0x77   :  { %369 = vperm.xlu2 %1282, %v332_v56  }
  0x7c   :  { %v218_v63 = vpop.permute.xlu2 %217 }
  0x7d   :  { %244 = vperm.xlu1 %1281, %v205_v61   ;;  %vm260_vm9 = vcmp.eq.s32.totalorder %v1562_v6, %v218_v63 }
  0x7e   :  { %v1153_v33 = vsel %vm260_vm9, 1.0, %v1379_v11 }
  0x7f   :  { %372 = vperm.xlu2 %1282, %v333_v62  }
  0x80   :  { %v87_v4 = vpop.permute.xlu1 %86 }
  0x81   :  { %v84_v5 = vpop.permute.xlu0 %83  ;;  %vm131_vm6 = vcmp.eq.s32.totalorder %v1562_v6, %v87_v4 }
  0x82   :  { %vm130_vm2 = vcmp.eq.s32.totalorder %v1562_v6, %v84_v5  ;;  %v1136_v24 = vsel %vm131_vm6, 1.0, %v1379_v11 }
  0x83   :  { %v1135_v12 = vsel %vm130_vm2, 1.0, %v1379_v11  ;;  %v307_v25 = vadd.f32 %v1152_v23, %v1136_v24 }
  0x84   :  { %v1564_v7 = vpop.permute.xlu2 %220 }
  0x85   :  { %1284 = vset.pattern.permute.xlu1 %v1376_v0  ;;  %v435_v30 = vadd.f32 %v1168_v27, %v307_v25  ;;  %vm261_vm13 = vcmp.eq.s32.totalorder %v1562_v6, %v1564_v7 }
  0x86   :  { %119 = vperm.xlu1 %1284, %v76_v41   ;;  %v1154_v43 = vsel %vm261_vm13, 1.0, %v1379_v11 }
  0x87   :  { %1285 = vset.pattern.permute.xlu2 %v1377_v1 }
  0x88   :  { %247 = vperm.xlu2 %1285, %v206_v9  }
  0x89   :  { %v340_v13 = vpop.permute.xlu1 %339 }
  0x8a   :  { %v212_v14 = vpop.permute.xlu0 %211  ;;  %vm386_vm3 = vcmp.eq.s32.totalorder %v1562_v6, %v340_v13 }
  0x8b   :  { %vm258_vm4 = vcmp.eq.s32.totalorder %v1562_v6, %v212_v14  ;;  %v1167_v18 = vsel %vm386_vm3, 1.0, %v1379_v11 }
  0x8c   :  { %v1151_v15 = vsel %vm258_vm4, 1.0, %v1379_v11 }
  0x8d   :  { %v306_v17 = vadd.f32 %v1151_v15, %v1135_v12  ;;  %v1585_v19 = vpop.permute.xlu2 %95  ;;  %v466_v15 = vld [vmem:[%s1974_s1 + $0x40] sm:$0xff] }
  0x8e   :  { %122 = vperm.xlu1 %1284, %v77_v16   ;;  %vm134_vm15 = vcmp.eq.s32.totalorder %v1562_v6, %v1585_v19  ;;  %1192 = vmatmul.msk.f32.gmra.mxu0 %vm476_vm1, %v466_v15 }
  0x8f   :  { %v434_v21 = vadd.f32 %v1167_v18, %v306_v17  ;;  %v1139_v51 = vsel %vm134_vm15, 1.0, %v1379_v11  ;;  %1209 = vmatmul.msk.f32.gmra.mxu1 %vm476_vm1, %v466_v15 }
  0x90   :  { %250 = vperm.xlu2 %1285, %v207_v20  }
  0x91   :  { %1217 = vmatmul.msk.f32.vlgmr.msrb.gmra.mxu2 %vm662_vm7, %v434_v21  ;;  %1233 = vmatmul.msk.f32.vlgmr.msrb.gmra.mxu3 %vm662_vm7, %v434_v21 }
  0x92   :  { %v90_v26 = vpop.permute.xlu1 %89 }
  0x93   :  { %vm132_vm10 = vcmp.eq.s32.totalorder %v1562_v6, %v90_v26  ;;  %v346_v29 = vpop.permute.xlu0 %345 }
  0x94   :  { %v1137_v34 = vsel %vm132_vm10, 1.0, %v1379_v11  ;;  %vm388_vm11 = vcmp.eq.s32.totalorder %v1562_v6, %v346_v29 }
  0x95   :  { %v1601_v31 = vpop.permute.xlu2 %98  ;;  %v308_v35 = vadd.f32 %v1153_v33, %v1137_v34  ;;  %v1169_v37 = vsel %vm388_vm11, 1.0, %v1379_v11  ;;  %v1685_v23 = vpop.f32.mrf.mxu3 }
  0x96   :  { %1287 = vset.pattern.permute.xlu1 %v1378_v8  ;;  %vm135_vm3 = vcmp.eq.s32.totalorder %v1562_v6, %v1601_v31  ;;  %v1687_v24 = vpop.f32.mrf.mxu2 }
  0x97   :  { %378 = vperm.xlu1 %1287, %v335_v28   ;;  %v436_v39 = vadd.f32 %v1169_v37, %v308_v35  ;;  %v1140_v60 = vsel %vm135_vm3, 1.0, %v1379_v11  ;;  %v942_v37 = vld [vmem:[%s1978_s5 + $0xf8] sm:$0xff] }
  0x98   :  { %1288 = vset.pattern.permute.xlu2 %v1376_v0  ;;  %1012 = vmatpush.msrb.mxu1 %v942_v37 }
  0x99   :  { %1218 = vmatmul.msk.f32.gmra.mxu2 %vm662_vm7, %v435_v30  ;;  %1234 = vmatmul.msk.f32.gmra.mxu3 %vm662_vm7, %v435_v30 }
  0x9a   :  { %v93_v36 = vpop.permute.xlu1 %92  ;;  %125 = vperm.xlu2 %1288, %v1552_v59  }
  0x9b   :  { %vm133_vm12 = vcmp.eq.s32.totalorder %v1562_v6, %v93_v36  ;;  %v926_v36 = vld [vmem:[%s1978_s5 + $0x78] sm:$0xff] }
  0x9c   :  { %v1138_v41 = vsel %vm133_vm12, 1.0, %v1379_v11  ;;  %v224_v45 = vpop.permute.xlu0 %223  ;;  %947 = vmatpush.msrb.mxu0 %v926_v36  ;;  %v928_v36 = vld [vmem:[%s1978_s5 + $0x88] sm:$0xff] }
  0x9d   :  { %v309_v46 = vadd.f32 %v1154_v43, %v1138_v41  ;;  %vm262_vm0 = vcmp.eq.s32.totalorder %v1562_v6, %v224_v45  ;;  %v1696_v28 = vpop.f32.mrf.mxu3  ;;  %v941_v41 = vld [vmem:[%s1978_s5 + $0xf0] sm:$0xff] }
  0x9e   :  { %v355_v0 = vpop.permute.xlu2 %354  ;;  %v1155_v52 = vsel %vm262_vm0, 1.0, %v1379_v11  ;;  %v1698_v29 = vpop.f32.mrf.mxu2  ;;  %1013 = vmatpush.msrb.mxu1 %v941_v41 }
  0x9f   :  { %381 = vperm.xlu1 %1287, %v336_v38   ;;  %v310_v55 = vadd.f32 %v1155_v52, %v1139_v51  ;;  %vm391_vm4 = vcmp.eq.s32.totalorder %v1562_v6, %v355_v0  ;;  %v925_v0 = vld [vmem:[%s1978_s5 + $0x70] sm:$0xff]  ;;  %v939_v51 = vld [vmem:[%s1978_s5 + $0xe0] sm:$0xff]  ;;  %v922_v52 = vld [vmem:[%s1978_s5 + $0x58] sm:$0xff] }
  0xa0   :  { %v1172_v61 = vsel %vm391_vm4, 1.0, %v1379_v11  ;;  %948 = vmatpush.msrb.mxu0 %v925_v0 }
  0xa1   :  { %1219 = vmatmul.msk.f32.gmra.mxu2 %vm662_vm7, %v436_v39  ;;  %1235 = vmatmul.msk.f32.gmra.mxu3 %vm662_vm7, %v436_v39 }
  0xa2   :  { %128 = vperm.xlu2 %1288, %v79_v42  }
  0xa3   :  { %v349_v44 = vpop.permute.xlu1 %348 }
  0xa4   :  { %vm389_vm14 = vcmp.eq.s32.totalorder %v1562_v6, %v349_v44 }
  0xa5   :  { %v1170_v48 = vsel %vm389_vm14, 1.0, %v1379_v11  ;;  %v102_v63 = vpop.permute.xlu0 %101  ;;  %v1722_v44 = vpop.f32.mrf.mxu3 }
  0xa6   :  { %v437_v49 = vadd.f32 %v1170_v48, %v309_v46  ;;  %v358_v54 = vpop.permute.xlu2 %357  ;;  %vm136_vm6 = vcmp.eq.s32.totalorder %v1562_v6, %v102_v63  ;;  %v1724_v45 = vpop.f32.mrf.mxu2  ;;  %v924_v46 = vld [vmem:[%s1978_s5 + $0x68] sm:$0xff] }
  0xa7   :  { %1290 = vset.pattern.permute.xlu1 %v1377_v1  ;;  %v1141_v5 = vsel %vm136_vm6, 1.0, %v1379_v11  ;;  %vm392_vm8 = vcmp.eq.s32.totalorder %v1562_v6, %v358_v54  ;;  %949 = vmatpush.msrb.mxu0 %v924_v46  ;;  %v921_v54 = vld [vmem:[%s1978_s5 + $0x50] sm:$0xff] }
  0xa8   :  { %256 = vperm.xlu1 %1290, %v209_v47   ;;  %v1173_v12 = vsel %vm392_vm8, 1.0, %v1379_v11  ;;  %v940_v47 = vld [vmem:[%s1978_s5 + $0xe8] sm:$0xff] }
  0xa9   :  { %1220 = vmatmul.msk.f32.gmra.mxu2 %vm662_vm7, %v437_v49  ;;  %1236 = vmatmul.msk.f32.gmra.mxu3 %vm662_vm7, %v437_v49 }
  0xaa   :  { %1291 = vset.pattern.permute.xlu2 %v1378_v8  ;;  %1014 = vmatpush.msrb.mxu1 %v940_v47 }
  0xab   :  { %v352_v1 = vpop.permute.xlu1 %351  ;;  %384 = vperm.xlu2 %1291, %v337_v50   ;;  %v923_v50 = vld [vmem:[%s1978_s5 + $0x60] sm:$0xff] }
  0xac   :  { %vm390_vm2 = vcmp.eq.s32.totalorder %v1562_v6, %v352_v1  ;;  %950 = vmatpush.msrb.mxu0 %v923_v50  ;;  %1015 = vmatpush.msrb.mxu1 %v939_v51  ;;  %v937_v1 = vld [vmem:[%s1978_s5 + $0xd0] sm:$0xff] }
  0xad   :  { %v1171_v56 = vsel %vm390_vm2, 1.0, %v1379_v11 }
  0xae   :  { %v438_v57 = vadd.f32 %v1171_v56, %v310_v55  ;;  %v361_v14 = vpop.permute.xlu0 %360  ;;  %951 = vmatpush.msrb.mxu0 %v922_v52  ;;  %1016 = vmatpush.msrb.mxu1 %v938_v53  ;;  %v920_v55 = vld [vmem:[%s1978_s5 + $0x48] sm:$0xff] }
  0xaf   :  { %v233_v59 = vpop.permute.xlu2 %232  ;;  %vm393_vm11 = vcmp.eq.s32.totalorder %v1562_v6, %v361_v14  ;;  %v936_v56 = vld [vmem:[%s1978_s5 + $0xc8] sm:$0xff] }
  0xb0   :  { %vm265_vm10 = vcmp.eq.s32.totalorder %v1562_v6, %v233_v59  ;;  %v1174_v19 = vsel %vm393_vm11, 1.0, %v1379_v11  ;;  %952 = vmatpush.msrb.mxu0 %v921_v54  ;;  %1017 = vmatpush.msrb.mxu1 %v937_v1  ;;  %v935_v59 = vld [vmem:[%s1978_s5 + $0xc0] sm:$0xff]  ;;  %v932_v14 = vld [vmem:[%s1978_s5 + $0xa8] sm:$0xff]  ;;  %v549_v54 = vpop.f32.mrf.mxu0  ;;  %v614_v1 = vpop.f32.mrf.mxu1 }
  0xb1   :  { %1221 = vmatmul.msk.f32.gmra.mxu2 %vm662_vm7, %v438_v57  ;;  %1237 = vmatmul.msk.f32.gmra.mxu3 %vm662_vm7, %v438_v57  ;;  %v1158_v16 = vsel %vm265_vm10, 1.0, %v1379_v11 }
  0xb2   :  { %953 = vmatpush.msrb.mxu0 %v920_v55  ;;  %1018 = vmatpush.msrb.mxu1 %v936_v56 }
  0xb4   :  { %v227_v8 = vpop.permute.xlu1 %226  ;;  %1019 = vmatpush.msrb.mxu1 %v935_v59 }
  0xb5   :  { %vm263_vm5 = vcmp.eq.s32.totalorder %v1562_v6, %v227_v8  ;;  %v919_v8 = vld [vmem:[%s1978_s5 + $0x40] sm:$0xff] }
  0xb6   :  { %v1156_v62 = vsel %vm263_vm5, 1.0, %v1379_v11  ;;  %954 = vmatpush.msrb.mxu0 %v919_v8 }
  0xb7   :  { %v311_v2 = vadd.f32 %v1156_v62, %v1140_v60  ;;  %v236_v9 = vpop.permute.xlu2 %235  ;;  %v239_v32 = vpop.permute.xlu0 %238 }
  0xb8   :  { %vm266_vm13 = vcmp.eq.s32.totalorder %v1562_v6, %v236_v9  ;;  %vm267_vm0 = vcmp.eq.s32.totalorder %v1562_v6, %v239_v32 }
  0xb9   :  { %v439_v3 = vadd.f32 %v1172_v61, %v311_v2  ;;  %v1159_v30 = vsel %vm266_vm13, 1.0, %v1379_v11  ;;  %v1160_v39 = vsel %vm267_vm0, 1.0, %v1379_v11  ;;  %v1772_v2 = vpop.f32.mrf.mxu3 }
  0xbb   :  { %1222 = vmatmul.msk.f32.gmra.mxu2 %vm662_vm7, %v439_v3  ;;  %1238 = vmatmul.msk.f32.gmra.mxu3 %vm662_vm7, %v439_v3  ;;  %v1774_v3 = vpop.f32.mrf.mxu2 }
  0xbc   :  { %v230_v4 = vpop.permute.xlu1 %229 }
  0xbd   :  { %vm264_vm9 = vcmp.eq.s32.totalorder %v1562_v6, %v230_v4 }
  0xbe   :  { %v1157_v7 = vsel %vm264_vm9, 1.0, %v1379_v11 }
  0xbf   :  { %v312_v10 = vadd.f32 %v1157_v7, %v1141_v5  ;;  %v918_v5 = vld [vmem:[%s1978_s5 + $0x38] sm:$0xff] }
  0xc0   :  { %v111_v21 = vpop.permute.xlu2 %110  ;;  %v117_v60 = vpop.permute.xlu0 %116  ;;  %v934_v7 = vld [vmem:[%s1978_s5 + $0xb8] sm:$0xff]  ;;  %955 = vmatpush.msrb.mxu0 %v918_v5 }
  0xc1   :  { %v440_v13 = vadd.f32 %v1173_v12, %v312_v10  ;;  %vm139_vm15 = vcmp.eq.s32.totalorder %v1562_v6, %v111_v21  ;;  %vm141_vm6 = vcmp.eq.s32.totalorder %v1562_v6, %v117_v60  ;;  %1020 = vmatpush.msrb.mxu1 %v934_v7  ;;  %v917_v10 = vld [vmem:[%s1978_s5 + $0x30] sm:$0xff] }
  0xc2   :  { %v1144_v38 = vsel %vm139_vm15, 1.0, %v1379_v11  ;;  %v933_v12 = vld [vmem:[%s1978_s5 + $0xb0] sm:$0xff]  ;;  %956 = vmatpush.msrb.mxu0 %v917_v10  ;;  %v552_v10 = vpop.f32.mrf.mxu0 }
  0xc3   :  { %1223 = vmatmul.msk.f32.gmra.mxu2 %vm662_vm7, %v440_v13  ;;  %1239 = vmatmul.msk.f32.gmra.mxu3 %vm662_vm7, %v440_v13  ;;  %v315_v43 = vadd.f32 %v1160_v39, %v1144_v38  ;;  %v916_v13 = vld [vmem:[%s1978_s5 + $0x28] sm:$0xff]  ;;  %v911_v39 = vld [vmem:[%s1978_s5] sm:$0xff] }
  0xc4   :  { %1021 = vmatpush.msrb.mxu1 %v933_v12  ;;  %957 = vmatpush.msrb.mxu0 %v916_v13  ;;  %v617_v12 = vpop.f32.mrf.mxu1 }
  0xc5   :  { %v105_v17 = vpop.permute.xlu1 %104 }
  0xc6   :  { %vm137_vm12 = vcmp.eq.s32.totalorder %v1562_v6, %v105_v17  ;;  %1022 = vmatpush.msrb.mxu1 %v932_v14 }
  0xc7   :  { %v1142_v18 = vsel %vm137_vm12, 1.0, %v1379_v11 }
  0xc8   :  { %v313_v20 = vadd.f32 %v1158_v16, %v1142_v18  ;;  %v1692_v26 = vpop.permute.xlu2 %113  ;;  %v1146_v16 = vsel %vm141_vm6, 1.0, %v1379_v11  ;;  %v915_v18 = vld [vmem:[%s1978_s5 + $0x20] sm:$0xff] }
  0xc9   :  { %vm140_vm3 = vcmp.eq.s32.totalorder %v1562_v6, %v1692_v26  ;;  %v1810_v26 = vpop.f32.mrf.mxu2  ;;  %958 = vmatpush.msrb.mxu0 %v915_v18  ;;  %v376_v32 = vpop.permute.xlu0 %375 }
  0xca   :  { %v441_v22 = vadd.f32 %v1174_v19, %v313_v20  ;;  %v1145_v61 = vsel %vm140_vm3, 1.0, %v1379_v11  ;;  %v931_v19 = vld [vmem:[%s1978_s5 + $0xa0] sm:$0xff]  ;;  %vm398_vm11 = vcmp.eq.s32.totalorder %v1562_v6, %v376_v32 }
  0xcb   :  { %1023 = vmatpush.msrb.mxu1 %v931_v19 }
  0xcc   :  { %1224 = vmatmul.msk.f32.gmra.mxu2 %vm662_vm7, %v441_v22  ;;  %1240 = vmatmul.msk.f32.gmra.mxu3 %vm662_vm7, %v441_v22 }
  0xcd   :  { %v108_v25 = vpop.permute.xlu1 %107 }
  0xce   :  { %vm138_vm1 = vcmp.eq.s32.totalorder %v1562_v6, %v108_v25  ;;  %v1808_v25 = vpop.f32.mrf.mxu3 }
  0xcf   :  { %v1143_v27 = vsel %vm138_vm1, 1.0, %v1379_v11 }
  0xd0   :  { %v314_v33 = vadd.f32 %v1159_v30, %v1143_v27  ;;  %v914_v27 = vld [vmem:[%s1978_s5 + $0x18] sm:$0xff] }
  0xd1   :  { %v370_v40 = vpop.permute.xlu2 %369  ;;  %v930_v30 = vld [vmem:[%s1978_s5 + $0x98] sm:$0xff]  ;;  %959 = vmatpush.msrb.mxu0 %v914_v27 }
  0xd2   :  { %vm396_vm4 = vcmp.eq.s32.totalorder %v1562_v6, %v370_v40  ;;  %1024 = vmatpush.msrb.mxu1 %v930_v30  ;;  %v927_v40 = vld [vmem:[%s1978_s5 + $0x80] sm:$0xff] }
  0xd3   :  { %v1177_v62 = vsel %vm396_vm4, 1.0, %v1379_v11 }
  0xd6   :  { %v364_v31 = vpop.permute.xlu1 %363  ;;  %v1844_v47 = vpop.f32.mrf.mxu3 }
  0xd7   :  { %vm394_vm14 = vcmp.eq.s32.totalorder %v1562_v6, %v364_v31 }
  0xd8   :  { %v1175_v34 = vsel %vm394_vm14, 1.0, %v1379_v11 }
  0xd9   :  { %v442_v35 = vadd.f32 %v1175_v34, %v314_v33  ;;  %v373_v57 = vpop.permute.xlu2 %372  ;;  %v913_v33 = vld [vmem:[%s1978_s5 + $0x10] sm:$0xff] }
  0xda   :  { %vm397_vm8 = vcmp.eq.s32.totalorder %v1562_v6, %v373_v57  ;;  %v929_v34 = vld [vmem:[%s1978_s5 + $0x90] sm:$0xff]  ;;  %960 = vmatpush.msrb.mxu0 %v913_v33  ;;  %v254_v57 = vpop.permute.xlu0 %253 }
  0xdb   :  { %1225 = vmatmul.msk.f32.gmra.mxu2 %vm662_vm7, %v442_v35  ;;  %1241 = vmatmul.msk.f32.gmra.mxu3 %vm662_vm7, %v442_v35  ;;  %v1178_v22 = vsel %vm397_vm8, 1.0, %v1379_v11  ;;  %v912_v35 = vld [vmem:[%s1978_s5 + $0x8] sm:$0xff]  ;;  %vm272_vm0 = vcmp.eq.s32.totalorder %v1562_v6, %v254_v57 }
  0xdc   :  { %1025 = vmatpush.msrb.mxu1 %v929_v34  ;;  %961 = vmatpush.msrb.mxu0 %v912_v35 }
  0xde   :  { %v367_v42 = vpop.permute.xlu1 %366  ;;  %1026 = vmatpush.msrb.mxu1 %v928_v36  ;;  %962 = vmatpush.msrb.mxu0 %v911_v39  ;;  %v1853_v52 = vpop.f32.mrf.mxu3 }
  0xdf   :  { %vm395_vm2 = vcmp.eq.s32.totalorder %v1562_v6, %v367_v42  ;;  %v1179_v42 = vsel %vm398_vm11, 1.0, %v1379_v11  ;;  %v555_v39 = vpop.f32.mrf.mxu0 }
  0xe0   :  { %v1176_v48 = vsel %vm395_vm2, 1.0, %v1379_v11  ;;  %1027 = vmatpush.msrb.mxu1 %v927_v40  ;;  %v620_v40 = vpop.f32.mrf.mxu1 }
  0xe1   :  { %v443_v49 = vadd.f32 %v1176_v48, %v315_v43  ;;  %v1846_v48 = vpop.f32.mrf.mxu2 }
  0xe2   :  { %v248_v17 = vpop.permute.xlu2 %247 }
  0xe3   :  { %1226 = vmatmul.msk.f32.gmra.mxu2 %vm662_vm7, %v443_v49  ;;  %1242 = vmatmul.msk.f32.gmra.mxu3 %vm662_vm7, %v443_v49  ;;  %vm270_vm10 = vcmp.eq.s32.totalorder %v1562_v6, %v248_v17 }
  0xe4   :  { %v1163_v37 = vsel %vm270_vm10, 1.0, %v1379_v11 }
  0xe7   :  { %v242_v58 = vpop.permute.xlu1 %241 }
  0xe8   :  { %vm268_vm5 = vcmp.eq.s32.totalorder %v1562_v6, %v242_v58 }
  0xe9   :  { %v1161_v63 = vsel %vm268_vm5, 1.0, %v1379_v11  ;;  %v1855_v53 = vpop.f32.mrf.mxu2 }
  0xea   :  { %v316_v4 = vadd.f32 %v1161_v63, %v1145_v61  ;;  %v251_v41 = vpop.permute.xlu2 %250  ;;  %v841_v63 = vld [vmem:[%s1977_s4] sm:$0x3] }
  0xeb   :  { %vm271_vm13 = vcmp.eq.s32.totalorder %v1562_v6, %v251_v41  ;;  %v1870_v7 = vperm.slane %v841_v63, 0 }
  0xec   :  { %v444_v9 = vadd.f32 %v1177_v62, %v316_v4  ;;  %v1164_v55 = vsel %vm271_vm13, 1.0, %v1379_v11  ;;  %v1165_v62 = vsel %vm272_vm0, 1.0, %v1379_v11 }
  0xee   :  { %1227 = vmatmul.msk.f32.gmra.mxu2 %vm662_vm7, %v444_v9  ;;  %1243 = vmatmul.msk.f32.gmra.mxu3 %vm662_vm7, %v444_v9  ;;  %v1872_v9 = vperm.slane %v841_v63, 1 }
  0xef   :  { %v245_v15 = vpop.permute.xlu1 %244 }
  0xf0   :  { %vm269_vm9 = vcmp.eq.s32.totalorder %v1562_v6, %v245_v15 }
  0xf1   :  { %v1162_v20 = vsel %vm269_vm9, 1.0, %v1379_v11 }
  0xf2   :  { %v317_v21 = vadd.f32 %v1162_v20, %v1146_v16 }
  0xf4   :  { %v445_v31 = vadd.f32 %v1178_v22, %v317_v21  ;;  %v126_v50 = vpop.permute.xlu2 %125 }
  0xf5   :  { %vm144_vm15 = vcmp.eq.s32.totalorder %v1562_v6, %v126_v50 }
  0xf6   :  { %1228 = vmatmul.msk.f32.gmra.mxu2 %vm662_vm7, %v445_v31  ;;  %1244 = vmatmul.msk.f32.gmra.mxu3 %vm662_vm7, %v445_v31  ;;  %v1149_v61 = vsel %vm144_vm15, 1.0, %v1379_v11 }
  0xf7   :  { %v320_v5 = vadd.f32 %v1165_v62, %v1149_v61 }
  0xf8   :  { %v120_v38 = vpop.permute.xlu1 %119 }
  0xf9   :  { %vm142_vm12 = vcmp.eq.s32.totalorder %v1562_v6, %v120_v38 }
  0xfa   :  { %v1147_v0 = vsel %vm142_vm12, 1.0, %v1379_v11 }
  0xfb   :  { %v318_v43 = vadd.f32 %v1163_v37, %v1147_v0 }
  0xfc   :  { %v129_v60 = vpop.permute.xlu2 %128 }
  0xfd   :  { %v446_v46 = vadd.f32 %v1179_v42, %v318_v43  ;;  %vm145_vm3 = vcmp.eq.s32.totalorder %v1562_v6, %v129_v60 }
  0xfe   :  { %v1150_v31 = vsel %vm145_vm3, 1.0, %v1379_v11 }
  0xff   :  { %1229 = vmatmul.msk.f32.gmra.mxu2 %vm662_vm7, %v446_v46  ;;  %1245 = vmatmul.msk.f32.gmra.mxu3 %vm662_vm7, %v446_v46 }
 0x100   :  { %v123_v49 = vpop.permute.xlu1 %122 }
 0x101   :  { %vm143_vm1 = vcmp.eq.s32.totalorder %v1562_v6, %v123_v49 }
 0x102   :  { %v1148_v51 = vsel %vm143_vm1, 1.0, %v1379_v11 }
 0x103   :  { %v319_v58 = vadd.f32 %v1164_v55, %v1148_v51  ;;  %v623_v55 = vpop.f32.mrf.mxu1 }
 0x105   :  { %v385_v21 = vpop.permute.xlu2 %384 }
 0x106   :  { %vm401_vm4 = vcmp.eq.s32.totalorder %v1562_v6, %v385_v21 }
 0x107   :  { %v1182_v37 = vsel %vm401_vm4, 1.0, %v1379_v11 }
 0x109   :  { %v379_v56 = vpop.permute.xlu1 %378 }
 0x10a   :  { %vm399_vm14 = vcmp.eq.s32.totalorder %v1562_v6, %v379_v56 }
 0x10b   :  { %v1180_v8 = vsel %vm399_vm14, 1.0, %v1379_v11 }
 0x10c   :  { %v447_v59 = vadd.f32 %v1180_v8, %v319_v58 }
 0x10e   :  { %1230 = vmatmul.msk.f32.gmra.mxu2 %vm662_vm7, %v447_v59  ;;  %1246 = vmatmul.msk.f32.gmra.mxu3 %vm662_vm7, %v447_v59 }
 0x111   :  { %v382_v4 = vpop.permute.xlu1 %381 }
 0x112   :  { %vm400_vm2 = vcmp.eq.s32.totalorder %v1562_v6, %v382_v4 }
 0x113   :  { %v1181_v13 = vsel %vm400_vm2, 1.0, %v1379_v11 }
 0x114   :  { %v728_v14 = vpop.f32.mrf.mxu2  ;;  %v793_v15 = vpop.f32.mrf.mxu3  ;;  %v448_v16 = vadd.f32 %v1181_v13, %v320_v5 }
 0x115   :  { %v729_v17 = vadd.f32 %v728_v14, %v549_v54  ;;  %v794_v18 = vadd.f32 %v793_v15, %v614_v1  ;;  %v558_v1 = vpop.f32.mrf.mxu0 }
 0x116   :  { %1231 = vmatmul.msk.f32.gmra.mxu2 %vm662_vm7, %v448_v16  ;;  %1247 = vmatmul.msk.f32.gmra.mxu3 %vm662_vm7, %v448_v16 }
 0x117   :  { %v847_v19 = vadd.f32 %v1870_v7, %v729_v17  ;;  %v848_v20 = vadd.f32 %v1872_v9, %v794_v18 }
 0x119   :  { %v879_v22 = vmax.f32 %v847_v19, 0.0  ;;  %v880_v27 = vmax.f32 %v848_v20, 0.0 }
 0x11a   :  { %v257_v30 = vpop.permute.xlu1 %256 }
 0x11b   :  { %963 = vmatmul.f32.vlgmr.msrb.gmra.mxu0 %v879_v22  ;;  %1028 = vmatmul.f32.vlgmr.msrb.gmra.mxu1 %v880_v27  ;;  %vm273_vm5 = vcmp.eq.s32.totalorder %v1562_v6, %v257_v30 }
 0x11c   :  { %v731_v32 = vpop.f32.mrf.mxu2  ;;  %v796_v33 = vpop.f32.mrf.mxu3  ;;  %v1166_v34 = vsel %vm273_vm5, 1.0, %v1379_v11 }
 0x11d   :  { %v732_v35 = vadd.f32 %v731_v32, %v552_v10  ;;  %v797_v36 = vadd.f32 %v796_v33, %v617_v12  ;;  %v321_v38 = vadd.f32 %v1166_v34, %v1150_v31  ;;  %v561_v5 = vpop.f32.mrf.mxu0  ;;  %v626_v10 = vpop.f32.mrf.mxu1 }
 0x11f   :  { %v849_v0 = vadd.f32 %v1870_v7, %v732_v35  ;;  %v850_v41 = vadd.f32 %v1872_v9, %v797_v36  ;;  %v449_v42 = vadd.f32 %v1182_v37, %v321_v38 }
 0x121   :  { %v881_v43 = vmax.f32 %v849_v0, 0.0  ;;  %v882_v46 = vmax.f32 %v850_v41, 0.0  ;;  %1232 = vmatmul.msk.f32.gmra.mxu2 %vm662_vm7, %v449_v42  ;;  %1248 = vmatmul.msk.f32.gmra.mxu3 %vm662_vm7, %v449_v42 }
 0x123   :  { %966 = vmatmul.f32.gmra.mxu0 %v881_v43  ;;  %1031 = vmatmul.f32.gmra.mxu1 %v882_v46 }
 0x124   :  { %v734_v6 = vpop.f32.mrf.mxu2  ;;  %v799_v49 = vpop.f32.mrf.mxu3 }
 0x125   :  { %v735_v50 = vadd.f32 %v734_v6, %v555_v39  ;;  %v800_v11 = vadd.f32 %v799_v49, %v620_v40  ;;  %v564_v20 = vpop.f32.mrf.mxu0  ;;  %v629_v21 = vpop.f32.mrf.mxu1 }
 0x127   :  { %v851_v51 = vadd.f32 %v1870_v7, %v735_v50  ;;  %v852_v54 = vadd.f32 %v1872_v9, %v800_v11 }
 0x129   :  { %v883_v56 = vmax.f32 %v851_v51, 0.0  ;;  %v884_v57 = vmax.f32 %v852_v54, 0.0 }
 0x12b   :  { %969 = vmatmul.f32.gmra.mxu0 %v883_v56  ;;  %1034 = vmatmul.f32.gmra.mxu1 %v884_v57 }
 0x12c   :  { %v737_v58 = vpop.f32.mrf.mxu2  ;;  %v802_v59 = vpop.f32.mrf.mxu3 }
 0x12d   :  { %v738_v8 = vadd.f32 %v737_v58, %v558_v1  ;;  %v803_v60 = vadd.f32 %v802_v59, %v623_v55  ;;  %v567_v36 = vpop.f32.mrf.mxu0  ;;  %v632_v37 = vpop.f32.mrf.mxu1 }
 0x12f   :  { %v853_v61 = vadd.f32 %v1870_v7, %v738_v8  ;;  %v854_v62 = vadd.f32 %v1872_v9, %v803_v60 }
 0x131   :  { %v885_v63 = vmax.f32 %v853_v61, 0.0  ;;  %v886_v4 = vmax.f32 %v854_v62, 0.0 }
 0x133   :  { %972 = vmatmul.f32.gmra.mxu0 %v885_v63  ;;  %1037 = vmatmul.f32.gmra.mxu1 %v886_v4 }
 0x134   :  { %v740_v12 = vpop.f32.mrf.mxu2  ;;  %v805_v14 = vpop.f32.mrf.mxu3 }
 0x135   :  { %v741_v13 = vadd.f32 %v740_v12, %v561_v5  ;;  %v806_v15 = vadd.f32 %v805_v14, %v626_v10  ;;  %v570_v6 = vpop.f32.mrf.mxu0  ;;  %v635_v49 = vpop.f32.mrf.mxu1 }
 0x137   :  { %v855_v16 = vadd.f32 %v1870_v7, %v741_v13  ;;  %v856_v17 = vadd.f32 %v1872_v9, %v806_v15 }
 0x139   :  { %v887_v18 = vmax.f32 %v855_v16, 0.0  ;;  %v888_v19 = vmax.f32 %v856_v17, 0.0 }
 0x13b   :  { %975 = vmatmul.f32.gmra.mxu0 %v887_v18  ;;  %1040 = vmatmul.f32.gmra.mxu1 %v888_v19 }
 0x13d   :  { %v573_v58 = vpop.f32.mrf.mxu0  ;;  %v638_v8 = vpop.f32.mrf.mxu1 }
 0x13e   :  { %v743_v22 = vpop.f32.mrf.mxu2  ;;  %v808_v27 = vpop.f32.mrf.mxu3 }
 0x13f   :  { %v744_v30 = vadd.f32 %v743_v22, %v564_v20  ;;  %v809_v31 = vadd.f32 %v808_v27, %v629_v21 }
 0x141   :  { %v857_v32 = vadd.f32 %v1870_v7, %v744_v30  ;;  %v858_v33 = vadd.f32 %v1872_v9, %v809_v31 }
 0x143   :  { %v889_v34 = vmax.f32 %v857_v32, 0.0  ;;  %v890_v35 = vmax.f32 %v858_v33, 0.0 }
 0x145   :  { %978 = vmatmul.f32.gmra.mxu0 %v889_v34  ;;  %1043 = vmatmul.f32.gmra.mxu1 %v890_v35 }
 0x146   :  { %v746_v38 = vpop.f32.mrf.mxu2  ;;  %v811_v39 = vpop.f32.mrf.mxu3 }
 0x147   :  { %v747_v40 = vadd.f32 %v746_v38, %v567_v36  ;;  %v812_v0 = vadd.f32 %v811_v39, %v632_v37 }
 0x149   :  { %v859_v41 = vadd.f32 %v1870_v7, %v747_v40  ;;  %v860_v42 = vadd.f32 %v1872_v9, %v812_v0 }
 0x14b   :  { %v891_v43 = vmax.f32 %v859_v41, 0.0  ;;  %v892_v46 = vmax.f32 %v860_v42, 0.0 }
 0x14d   :  { %981 = vmatmul.f32.gmra.mxu0 %v891_v43  ;;  %1046 = vmatmul.f32.gmra.mxu1 %v892_v46 }
 0x14f   :  { %v749_v50 = vpop.f32.mrf.mxu2  ;;  %v814_v11 = vpop.f32.mrf.mxu3 }
 0x150   :  { %v750_v51 = vadd.f32 %v749_v50, %v570_v6  ;;  %v815_v54 = vadd.f32 %v814_v11, %v635_v49  ;;  %v1921_v50 = vld [vmem:[#allocation6] ss:$0 sm:$0xff] }
 0x152   :  { %v861_v1 = vadd.f32 %v1870_v7, %v750_v51  ;;  %v862_v55 = vadd.f32 %v1872_v9, %v815_v54 }
 0x154   :  { %v893_v56 = vmax.f32 %v861_v1, 0.0  ;;  %v894_v57 = vmax.f32 %v862_v55, 0.0 }
 0x156   :  { %984 = vmatmul.f32.gmra.mxu0 %v893_v56  ;;  %1049 = vmatmul.f32.gmra.mxu1 %v894_v57 }
 0x15e   :  { %v752_v59 = vpop.f32.mrf.mxu2  ;;  %v817_v60 = vpop.f32.mrf.mxu3 }
 0x15f   :  { %v753_v61 = vadd.f32 %v752_v59, %v573_v58  ;;  %v818_v62 = vadd.f32 %v817_v60, %v638_v8 }
 0x161   :  { %v863_v63 = vadd.f32 %v1870_v7, %v753_v61  ;;  %v864_v4 = vadd.f32 %v1872_v9, %v818_v62 }
 0x163   :  { %v895_v5 = vmax.f32 %v863_v63, 0.0  ;;  %v896_v10 = vmax.f32 %v864_v4, 0.0 }
 0x165   :  { %987 = vmatmul.f32.gmra.mxu0 %v895_v5  ;;  %1052 = vmatmul.f32.gmra.mxu1 %v896_v10 }
 0x166   :  { %v755_v12 = vpop.f32.mrf.mxu2  ;;  %v820_v13 = vpop.f32.mrf.mxu3 }
 0x167   :  { %v756_v14 = vadd.f32 %v755_v12, %v1685_v23  ;;  %v821_v15 = vadd.f32 %v820_v13, %v1687_v24 }
 0x169   :  { %v865_v16 = vadd.f32 %v1870_v7, %v756_v14  ;;  %v866_v17 = vadd.f32 %v1872_v9, %v821_v15 }
 0x16b   :  { %v897_v18 = vmax.f32 %v865_v16, 0.0  ;;  %v898_v19 = vmax.f32 %v866_v17, 0.0 }
 0x16d   :  { %990 = vmatmul.f32.gmra.mxu0 %v897_v18  ;;  %1055 = vmatmul.f32.gmra.mxu1 %v898_v19 }
 0x171   :  { %v758_v20 = vpop.f32.mrf.mxu2  ;;  %v823_v21 = vpop.f32.mrf.mxu3 }
 0x172   :  { %v759_v22 = vadd.f32 %v758_v20, %v1696_v28  ;;  %v824_v27 = vadd.f32 %v823_v21, %v1698_v29 }
 0x174   :  { %v867_v30 = vadd.f32 %v1870_v7, %v759_v22  ;;  %v868_v23 = vadd.f32 %v1872_v9, %v824_v27 }
 0x176   :  { %v899_v31 = vmax.f32 %v867_v30, 0.0  ;;  %v900_v24 = vmax.f32 %v868_v23, 0.0 }
 0x178   :  { %993 = vmatmul.f32.gmra.mxu0 %v899_v31  ;;  %1058 = vmatmul.f32.gmra.mxu1 %v900_v24 }
 0x179   :  { %v761_v32 = vpop.f32.mrf.mxu2  ;;  %v826_v33 = vpop.f32.mrf.mxu3 }
 0x17a   :  { %v762_v34 = vadd.f32 %v761_v32, %v1722_v44  ;;  %v827_v35 = vadd.f32 %v826_v33, %v1724_v45 }
 0x17c   :  { %v869_v36 = vadd.f32 %v1870_v7, %v762_v34  ;;  %v870_v28 = vadd.f32 %v1872_v9, %v827_v35 }
 0x17e   :  { %v901_v37 = vmax.f32 %v869_v36, 0.0  ;;  %v902_v29 = vmax.f32 %v870_v28, 0.0 }
 0x180   :  { %996 = vmatmul.f32.gmra.mxu0 %v901_v37  ;;  %1061 = vmatmul.f32.gmra.mxu1 %v902_v29 }
 0x182   :  { %v764_v38 = vpop.f32.mrf.mxu2  ;;  %v829_v39 = vpop.f32.mrf.mxu3 }
 0x183   :  { %v765_v40 = vadd.f32 %v764_v38, %v1772_v2  ;;  %v830_v0 = vadd.f32 %v829_v39, %v1774_v3 }
 0x185   :  { %v871_v41 = vadd.f32 %v1870_v7, %v765_v40  ;;  %v872_v44 = vadd.f32 %v1872_v9, %v830_v0 }
 0x187   :  { %v903_v42 = vmax.f32 %v871_v41, 0.0  ;;  %v904_v45 = vmax.f32 %v872_v44, 0.0 }
 0x189   :  { %999 = vmatmul.f32.gmra.mxu0 %v903_v42  ;;  %1064 = vmatmul.f32.gmra.mxu1 %v904_v45 }
 0x191   :  { %v767_v43 = vpop.f32.mrf.mxu2  ;;  %v832_v46 = vpop.f32.mrf.mxu3 }
 0x192   :  { %v768_v6 = vadd.f32 %v767_v43, %v1808_v25  ;;  %v833_v49 = vadd.f32 %v832_v46, %v1810_v26 }
 0x194   :  { %v873_v2 = vadd.f32 %v1870_v7, %v768_v6  ;;  %v874_v3 = vadd.f32 %v1872_v9, %v833_v49 }
 0x196   :  { %v905_v11 = vmax.f32 %v873_v2, 0.0  ;;  %v906_v51 = vmax.f32 %v874_v3, 0.0 }
 0x198   :  { %v964_v54 = vpop.f32.mrf.mxu0  ;;  %v1029_v1 = vpop.f32.mrf.mxu1  ;;  %1002 = vmatmul.f32.gmra.mxu0 %v905_v11  ;;  %1067 = vmatmul.f32.gmra.mxu1 %v906_v51 }
 0x199   :  { %v965_v55 = vadd.f32 %v1921_v50, %v964_v54  ;;  %v770_v56 = vpop.f32.mrf.mxu2  ;;  %v835_v57 = vpop.f32.mrf.mxu3 }
 0x19a   :  { %v771_v25 = vadd.f32 %v770_v56, %v1844_v47  ;;  %v836_v26 = vadd.f32 %v835_v57, %v1846_v48 }
 0x19b   :  { %v1926_v58 = vadd.f32 %v1029_v1, %v965_v55 }
 0x19c   :  { %v875_v8 = vadd.f32 %v1870_v7, %v771_v25  ;;  %v876_v59 = vadd.f32 %v1872_v9, %v836_v26 }
 0x19e   :  { %v907_v60 = vmax.f32 %v875_v8, 0.0  ;;  %v908_v61 = vmax.f32 %v876_v59, 0.0 }
 0x1a0   :  { %v967_v62 = vpop.f32.mrf.mxu0  ;;  %v1032_v63 = vpop.f32.mrf.mxu1  ;;  %1005 = vmatmul.f32.gmra.mxu0 %v907_v60  ;;  %1070 = vmatmul.f32.gmra.mxu1 %v908_v61 }
 0x1a1   :  { %v968_v4 = vadd.f32 %v1921_v50, %v967_v62 }
 0x1a3   :  { %v1933_v5 = vadd.f32 %v1032_v63, %v968_v4 }
 0x1a4   :  { %v773_v10 = vpop.f32.mrf.mxu2  ;;  %v838_v12 = vpop.f32.mrf.mxu3 }
 0x1a5   :  { %v774_v47 = vadd.f32 %v773_v10, %v1853_v52  ;;  %v839_v48 = vadd.f32 %v838_v12, %v1855_v53 }
 0x1a7   :  { %v877_v13 = vadd.f32 %v1870_v7, %v774_v47  ;;  %v878_v14 = vadd.f32 %v1872_v9, %v839_v48 }
 0x1a8   :  { %v970_v15 = vpop.f32.mrf.mxu0  ;;  %v1035_v16 = vpop.f32.mrf.mxu1 }
 0x1a9   :  { %v971_v17 = vadd.f32 %v1921_v50, %v970_v15  ;;  %v909_v18 = vmax.f32 %v877_v13, 0.0  ;;  %v910_v19 = vmax.f32 %v878_v14, 0.0 }
 0x1ab   :  { %v1940_v20 = vadd.f32 %v1035_v16, %v971_v17  ;;  %1008 = vmatmul.f32.gmra.mxu0 %v909_v18  ;;  %1073 = vmatmul.f32.gmra.mxu1 %v910_v19 }
 0x1b0   :  { %v973_v21 = vpop.f32.mrf.mxu0  ;;  %v1038_v52 = vpop.f32.mrf.mxu1 }
 0x1b1   :  { %v974_v22 = vadd.f32 %v1921_v50, %v973_v21 }
 0x1b3   :  { %v1943_v27 = vadd.f32 %v1038_v52, %v974_v22 }
 0x1b8   :  { %v976_v53 = vpop.f32.mrf.mxu0  ;;  %v1041_v9 = vpop.f32.mrf.mxu1 }
 0x1b9   :  { %v977_v7 = vadd.f32 %v1921_v50, %v976_v53  ;;  %v1080_v53 = vmax.f32 %v1943_v27, 0.0 }
 0x1bb   :  { %v1946_v30 = vadd.f32 %v1041_v9, %v977_v7  ;;  %v1079_v7 = vmax.f32 %v1940_v20, 0.0  ;;  %v1078_v9 = vmax.f32 %v1933_v5, 0.0 }
 0x1c2   :  { %v979_v23 = vpop.f32.mrf.mxu0  ;;  %v1044_v31 = vpop.f32.mrf.mxu1 }
 0x1c3   :  { %v980_v24 = vadd.f32 %v1921_v50, %v979_v23  ;;  %v1077_v23 = vmax.f32 %v1926_v58, 0.0 }
 0x1c5   :  { %v1045_v32 = vadd.f32 %v1044_v31, %v980_v24  ;;  %v1093_v31 = vld [vmem:[%s1980_s7] sm:$0x1] }
 0x1c7   :  { %v1082_v52 = vmax.f32 %v1045_v32, 0.0 }
 0x1ca   :  { %v982_v33 = vpop.f32.mrf.mxu0  ;;  %v1047_v35 = vpop.f32.mrf.mxu1 }
 0x1cb   :  { %v983_v34 = vadd.f32 %v1921_v50, %v982_v33 }
 0x1cd   :  { %v1048_v36 = vadd.f32 %v1047_v35, %v983_v34 }
 0x1cf   :  { %v1083_v22 = vmax.f32 %v1048_v36, 0.0 }
 0x1d3   :  { %v985_v28 = vpop.f32.mrf.mxu0  ;;  %v1050_v29 = vpop.f32.mrf.mxu1 }
 0x1d4   :  { %v986_v37 = vadd.f32 %v1921_v50, %v985_v28 }
 0x1d6   :  { %v1051_v38 = vadd.f32 %v1050_v29, %v986_v37 }
 0x1d8   :  { %v1084_v21 = vmax.f32 %v1051_v38, 0.0 }
 0x1e2   :  { %v988_v39 = vpop.f32.mrf.mxu0  ;;  %v1053_v40 = vpop.f32.mrf.mxu1 }
 0x1e3   :  { %v989_v0 = vadd.f32 %v1921_v50, %v988_v39 }
 0x1e5   :  { %v1054_v41 = vadd.f32 %v1053_v40, %v989_v0 }
 0x1e7   :  { %v1085_v19 = vmax.f32 %v1054_v41, 0.0 }
 0x1ea   :  { %v991_v44 = vpop.f32.mrf.mxu0  ;;  %v1056_v45 = vpop.f32.mrf.mxu1 }
 0x1eb   :  { %v992_v42 = vadd.f32 %v1921_v50, %v991_v44 }
 0x1ed   :  { %v1057_v43 = vadd.f32 %v1056_v45, %v992_v42 }
 0x1ef   :  { %v1086_v18 = vmax.f32 %v1057_v43, 0.0 }
 0x1f5   :  { %v994_v46 = vpop.f32.mrf.mxu0  ;;  %v1059_v6 = vpop.f32.mrf.mxu1 }
 0x1f6   :  { %v995_v48 = vadd.f32 %v1921_v50, %v994_v46 }
 0x1f8   :  { %v1060_v15 = vadd.f32 %v1059_v6, %v995_v48 }
 0x1fa   :  { %v1087_v17 = vmax.f32 %v1060_v15, 0.0 }
 0x1fd   :  { %v997_v49 = vpop.f32.mrf.mxu0  ;;  %v1062_v2 = vpop.f32.mrf.mxu1 }
 0x1fe   :  { %v998_v10 = vadd.f32 %v1921_v50, %v997_v49 }
 0x200   :  { %v1063_v13 = vadd.f32 %v1062_v2, %v998_v10 }
 0x202   :  { %v1088_v16 = vmax.f32 %v1063_v13, 0.0 }
 0x206   :  { %v1000_v3 = vpop.f32.mrf.mxu0  ;;  %v1065_v11 = vpop.f32.mrf.mxu1 }
 0x207   :  { %v1001_v62 = vadd.f32 %v1921_v50, %v1000_v3 }
 0x209   :  { %v1066_v12 = vadd.f32 %v1065_v11, %v1001_v62 }
 0x20b   :  { %v1089_v14 = vmax.f32 %v1066_v12, 0.0 }
 0x215   :  { %v1003_v51 = vpop.f32.mrf.mxu0  ;;  %v1068_v54 = vpop.f32.mrf.mxu1 }
 0x216   :  { %v1004_v59 = vadd.f32 %v1921_v50, %v1003_v51 }
 0x218   :  { %v1069_v63 = vadd.f32 %v1068_v54, %v1004_v59 }
 0x21a   :  { %v1090_v47 = vmax.f32 %v1069_v63, 0.0 }
 0x21d   :  { %v1006_v1 = vpop.f32.mrf.mxu0  ;;  %v1071_v55 = vpop.f32.mrf.mxu1 }
 0x21e   :  { %v1007_v57 = vadd.f32 %v1921_v50, %v1006_v1 }
 0x220   :  { %v1072_v60 = vadd.f32 %v1071_v55, %v1007_v57 }
 0x222   :  { %v1091_v4 = vmax.f32 %v1072_v60, 0.0 }
 0x228   :  { %v1009_v56 = vpop.f32.mrf.mxu0  ;;  %v1074_v26 = vpop.f32.mrf.mxu1 }
 0x229   :  { %v1010_v25 = vadd.f32 %v1921_v50, %v1009_v56  ;;  %v1081_v50 = vmax.f32 %v1946_v30, 0.0  ;;  %v1095_v30 = vstv %s1981_s8 }
 0x22b   :  { %v1075_v8 = vadd.f32 %v1074_v26, %v1010_v25 }
 0x22d   :  { %v1092_v61 = vmax.f32 %v1075_v8, 0.0 }
 0x22f   :  { %1096 = vmatpush.xpose.msra.mxu2 %v1092_v61 }
 0x233   :  { %1097 = vmatpush.xpose.msra.mxu2 %v1091_v4 }
 0x237   :  { %1098 = vmatpush.xpose.msra.mxu2 %v1090_v47 }
 0x23b   :  { %1099 = vmatpush.xpose.msra.mxu2 %v1089_v14 }
 0x23f   :  { %1100 = vmatpush.xpose.msra.mxu2 %v1088_v16 }
 0x243   :  { %1101 = vmatpush.xpose.msra.mxu2 %v1087_v17 }
 0x247   :  { %1102 = vmatpush.xpose.msra.mxu2 %v1086_v18 }
 0x24b   :  { %1103 = vmatpush.xpose.msra.mxu2 %v1085_v19 }
 0x24f   :  { %1104 = vmatpush.xpose.msra.mxu2 %v1084_v21 }
 0x253   :  { %1105 = vmatpush.xpose.msra.mxu2 %v1083_v22 }
 0x257   :  { %1106 = vmatpush.xpose.msra.mxu2 %v1082_v52 }
 0x25b   :  { %1107 = vmatpush.xpose.msra.mxu2 %v1081_v50 }
 0x25f   :  { %1108 = vmatpush.xpose.msra.mxu2 %v1080_v53 }
 0x263   :  { %1109 = vmatpush.xpose.msra.mxu2 %v1079_v7 }
 0x267   :  { %1110 = vmatpush.xpose.msra.mxu2 %v1078_v9 }
 0x26b   :  { %1111 = vmatpush.xpose.msra.mxu2 %v1077_v23 }
 0x26e   :  { %1112 = vmatmul.f32.vlgmr.msra.gmra.mxu2 %v1093_v31 }
 0x2f1   :  { %v1113_v5 = vpop.f32.mrf.mxu2 }
 0x2f2   :  { %v1114_v20 = vadd.f32 %v1113_v5, %v1095_v30 }
 0x2f4   :  { %1116 = vst [vmem:[#allocation8] sm:$0x1] %v1114_v20 }
 0x2f5   :  { %1127 = dma.vmem_to_hbm [thread:$0]  %s1123_s30, 16, %s1125_s0, [#allocation5]  }
 0x2f6   :  { %1370 = dma.done.wait [#allocation5], 16  }
 0x2f7   :  { %1371 = vsyncadd [#allocation5], 4294967280 }
 0x2f8   :  { %1132 = vsyncpa [#allocation4], 1 }
 0x2f9   :  { %1133 = vsyncpa [#allocation7], 1 }
 0x2fa   :  { %1134 = vsyncpa [#allocation5], 1 }

</bundles_post_ra>
